<compile_context>
chip_gen: v7x
topology: tpu7x:2x2x1
jax: 0.10.0
libtpu: 0.0.40
codegen_flags: <defaults>
</compile_context>

<pallas_src>
import functools

import jax
import jax.numpy as jnp
from jax import lax
from jax.experimental import pallas as pl
from jax.experimental.pallas import tpu as pltpu


# ----------------------------------------------------------------------------
# Kernel
# ----------------------------------------------------------------------------
def _cross_attention_kernel(x_ref, y_ref,
                            wq_ref, bq_ref,
                            wkv_ref, bkv_ref,
                            o_ref, *, scale, dv, flatten_proj, flatten_out):
    # Per-step tiles: x_ref (Bb, Lq, Dq), y_ref (Bb, Lk, Dk),
    #                 o_ref (Bb, Lq*Dv) if flatten_out else (Bb, Lq, Dv).
    Bb, Lq, Dq = x_ref.shape
    _, Lk, Dk = y_ref.shape

    wq = wq_ref[...]
    bq = bq_ref[...]
    wkv = wkv_ref[...]
    bkv = bkv_ref[...]

    if flatten_proj:
        # Fold batch into the matmul M dimension (no relayout: Lq, Lk are
        # multiples of the 8-sublane tile).
        x2 = x_ref[...].reshape(Bb * Lq, Dq)
        y2 = y_ref[...].reshape(Bb * Lk, Dk)
        q = jnp.dot(x2, wq, preferred_element_type=jnp.float32) + bq
        kv = jnp.dot(y2, wkv, preferred_element_type=jnp.float32) + bkv
        # Fold the softmax scale into q (cheaper than scaling (Lq, Lk) scores).
        q = (q * scale).reshape(Bb, Lq, dv)
        k = kv[:, :dv].reshape(Bb, Lk, dv)
        v = kv[:, dv:].reshape(Bb, Lk, dv)
    else:
        # Batched projections (avoid the relayout copy a reshape would cost
        # when L is not a multiple of 8).
        q = lax.dot_general(x_ref[...], wq, (((2,), (0,)), ((), ())),
                            preferred_element_type=jnp.float32) + bq[None]
        kv = lax.dot_general(y_ref[...], wkv, (((2,), (0,)), ((), ())),
                             preferred_element_type=jnp.float32) + bkv[None]
        q = q * scale
        k = kv[..., :dv]
        v = kv[..., dv:]

    # ---- Scaled dot-product attention --------------------------------------
    # Contract over the shared feature dim directly (no k.T / XLU transpose).
    s = lax.dot_general(q, k, (((2,), (2,)), ((0,), (0,))),
                        preferred_element_type=jnp.float32)      # (Bb, Lq, Lk)

    # Max-stabilized softmax in f32; Lk is unpadded so no key mask is needed.
    s_max = jnp.max(s, axis=-1, keepdims=True)
    p = jnp.exp(s - s_max)
    denom = jnp.sum(p, axis=-1, keepdims=True)
    p = p * pl.reciprocal(denom, approx=False)        # exact; only Bb*Lq elems

    out = lax.dot_general(p, v, (((2,), (1,)), ((0,), (0,))),
                          preferred_element_type=jnp.float32)    # (Bb, Lq, Dv)

    if flatten_out:
        # Lane-dense output slab -> unmasked vector stores.
        o_ref[...] = out.reshape(Bb, Lq * dv).astype(o_ref.dtype)
    else:
        o_ref[...] = out.astype(o_ref.dtype)


# ----------------------------------------------------------------------------
# Generation-aware sizing
# ----------------------------------------------------------------------------
def _tpu_vmem_and_cores():
    """(vmem_capacity_bytes, tensorcores_per_chip) with safe fallbacks."""
    vmem = 128 << 20
    try:
        info = pltpu.get_tpu_info()
        vmem = int(getattr(info, "vmem_capacity_bytes", vmem))
    except Exception:
        pass
    kind = ""
    try:
        kind = jax.devices()[0].device_kind.lower()
    except Exception:
        pass
    # v7x: 64 MiB VMEM per TC, 2 TensorCores per chip.
    n_tc = 2 if ("7" in kind or vmem <= (64 << 20)) else 1
    return vmem, n_tc


def _pick_block_b(B, Lq, Lk, Dq, Dk, Dv, itemsize, *,
                  budget_bytes, max_block_b, target_step_bytes=4 << 20):
    """Largest divisor of B (<= max_block_b) whose working set fits the VMEM
    budget, stopping once the per-step I/O reaches ~target_step_bytes (enough
    to amortize the ~0.35us grid-step overhead against HBM bandwidth)."""
    f32 = 4
    per_b_io = itemsize * (Lq * Dq + Lk * Dk + Lq * Dv)          # HBM bytes / batch
    per_b_vmem = (2 * per_b_io                                   # double-buffered tiles
                  + f32 * (2 * Lq * Dv + 2 * Lk * Dv             # q, out, k, v
                           + Lk * 2 * Dv                         # fused kv temp
                           + Lq * Lk))                           # scores
    best = 1
    for bb in range(1, max_block_b + 1):
        if B % bb:
            continue
        if bb * per_b_vmem > budget_bytes:
            break
        best = bb
        if bb * per_b_io >= target_step_bytes:
            break
    return best


def _vmem_limit_bytes(block_b, Lq, Lk, Dq, Dk, Dv, itemsize, cap):
    f32 = 4
    io = 2 * itemsize * block_b * (Lq * Dq + Lk * Dk + Lq * Dv)
    w = 2 * itemsize * (Dq * Dv + Dk * 2 * Dv + 3 * Dv)
    tmp = f32 * block_b * (2 * Lq * Dv + 2 * Lk * Dv + Lk * 2 * Dv + Lq * Lk)
    est = 4 * (io + w + tmp) + (4 << 20)                 # generous headroom
    return int(min(max(est, 16 << 20), cap))


# ----------------------------------------------------------------------------
# Wrapper
# ----------------------------------------------------------------------------
def cross_attention(x, y, wq, bq, wk, bk, wv, bv):
    """x: (B, Lq, Dq), y: (B, Lk, Dk); weights (Din, Dv), biases (1, Dv)."""
    B, Lq, Dq = x.shape
    By, Lk, Dk = y.shape
    assert By == B
    Dv = wq.shape[1]
    scale = float(Dv) ** -0.5
    out_dtype = x.dtype
    itemsize = jnp.dtype(x.dtype).itemsize

    # Fuse key/value projections: one (Dk, 2*Dv) matmul on the y side.
    wkv = jnp.concatenate([wk, wv], axis=1)
    bkv = jnp.concatenate([bk, bv], axis=1)

    flatten_proj = (Lq % 8 == 0) and (Lk % 8 == 0)
    flatten_out = flatten_proj and ((Lq * Dv) % 128 == 0)

    vmem_bytes, n_tc = _tpu_vmem_and_cores()
    if vmem_bytes <= (64 << 20):          # v7x-class: 64 MiB per TC
        pick_budget, limit_cap = 28 << 20, 40 << 20
    else:                                 # v5e / v6e: 128 MiB
        pick_budget, limit_cap = 56 << 20, 96 << 20

    # On 2-TC chips keep >= 2 grid steps so the "parallel" axis can shard.
    max_block_b = max(1, B // 2) if (n_tc >= 2 and B >= 2) else B
    block_b = _pick_block_b(B, Lq, Lk, Dq, Dk, Dv, itemsize,
                            budget_bytes=pick_budget, max_block_b=max_block_b)
    grid = (B // block_b,)

    kernel = functools.partial(_cross_attention_kernel, scale=scale, dv=Dv,
                               flatten_proj=flatten_proj, flatten_out=flatten_out)

    if flatten_out:
        out_shape = jax.ShapeDtypeStruct((B, Lq * Dv), out_dtype)
        out_spec = pl.BlockSpec((block_b, Lq * Dv), lambda b: (b, 0))
    else:
        out_shape = jax.ShapeDtypeStruct((B, Lq, Dv), out_dtype)
        out_spec = pl.BlockSpec((block_b, Lq, Dv), lambda b: (b, 0, 0))

    full = lambda shape: pl.BlockSpec(shape, lambda b: (0,) * len(shape))

    out = pl.pallas_call(
        kernel,
        out_shape=out_shape,
        grid_spec=pltpu.PrefetchScalarGridSpec(
            num_scalar_prefetch=0,
            grid=grid,
            in_specs=[
                pl.BlockSpec((block_b, Lq, Dq), lambda b: (b, 0, 0)),   # x
                pl.BlockSpec((block_b, Lk, Dk), lambda b: (b, 0, 0)),   # y
                full((Dq, Dv)), full((1, Dv)),                          # wq, bq
                full((Dk, 2 * Dv)), full((1, 2 * Dv)),                  # wkv, bkv
            ],
            out_specs=out_spec,
        ),
        compiler_params=pltpu.CompilerParams(
            dimension_semantics=("parallel",),
            vmem_limit_bytes=_vmem_limit_bytes(block_b, Lq, Lk, Dq, Dk, Dv,
                                               itemsize, limit_cap)),
    )(x, y, wq, bq, wkv, bkv)

    if flatten_out:
        out = out.reshape(B, Lq, Dv)
    return out


# ----------------------------------------------------------------------------
# Pure-JAX reference
# ----------------------------------------------------------------------------
def reference(x, y, wq, bq, wk, bk, wv, bv):
    Dv = wq.shape[1]
    q = jnp.einsum("bld,dv->blv", x, wq, precision="highest") + bq
    k = jnp.einsum("bld,dv->blv", y, wk, precision="highest") + bk
    v = jnp.einsum("bld,dv->blv", y, wv, precision="highest") + bv
    s = jnp.einsum("bqd,bkd->bqk", q, k, precision="highest") * (Dv ** -0.5)
    p = jax.nn.softmax(s, axis=-1)
    return jnp.einsum("bqk,bkd->bqd", p, v, precision="highest")


if __name__ == "__main__":
    # Small deterministic shapes consistent with the module's forward.
    B, Lq, Lk = 2, 8, 8
    dim_q, dim_k, dim_v = 32, 16, 32

    key = jax.random.PRNGKey(0)
    kx, ky, k1, k2, k3, k4, k5, k6 = jax.random.split(key, 8)

    x = jax.random.normal(kx, (B, Lq, dim_q), dtype=jnp.float32)
    y = jax.random.normal(ky, (B, Lk, dim_k), dtype=jnp.float32)

    # nn.Linear-style deterministic init; stored as (in, out) for the kernel.
    wq = jax.random.normal(k1, (dim_q, dim_v), dtype=jnp.float32) * (dim_q ** -0.5)
    bq = jax.random.normal(k2, (1, dim_v), dtype=jnp.float32) * 0.01
    wk = jax.random.normal(k3, (dim_k, dim_v), dtype=jnp.float32) * (dim_k ** -0.5)
    bk = jax.random.normal(k4, (1, dim_v), dtype=jnp.float32) * 0.01
    wv = jax.random.normal(k5, (dim_k, dim_v), dtype=jnp.float32) * (dim_k ** -0.5)
    bv = jax.random.normal(k6, (1, dim_v), dtype=jnp.float32) * 0.01

    # --- f32 path: strict correctness check (exact softmax normalization) ---
    out = cross_attention(x, y, wq, bq, wk, bk, wv, bv)
    out = jax.block_until_ready(out)

    ref = reference(x, y, wq, bq, wk, bk, wv, bv)
    assert out.shape == (B, Lq, dim_v)
    assert jnp.allclose(out, ref, atol=5e-4, rtol=5e-4), "mismatch vs reference"

    # --- bf16 I/O smoke run (half the HBM bytes on v6e/v7x); softmax and all
    # accumulation remain in f32 inside the kernel. ---------------------------
    to_bf16 = lambda a: a.astype(jnp.bfloat16)
    out_bf16 = cross_attention(to_bf16(x), to_bf16(y),
                               to_bf16(wq), to_bf16(bq),
                               to_bf16(wk), to_bf16(bk),
                               to_bf16(wv), to_bf16(bv))
    out_bf16 = jax.block_until_ready(out_bf16)
    assert out_bf16.shape == (B, Lq, dim_v) and out_bf16.dtype == jnp.bfloat16
    assert bool(jnp.all(jnp.isfinite(out_bf16.astype(jnp.float32))))

    print("KERNEL_OK")
</pallas_src>

<mosaic_0001>
module attributes {stable_mosaic.version = 11 : i64} {
  func.func @_cross_attention_kernel(%arg0: i32, %arg1: memref<2x8x32xf32, #tpu.memory_space<vmem>>, %arg2: memref<2x8x16xf32, #tpu.memory_space<vmem>>, %arg3: memref<32x32xf32, #tpu.memory_space<vmem>>, %arg4: memref<1x32xf32, #tpu.memory_space<vmem>>, %arg5: memref<16x64xf32, #tpu.memory_space<vmem>>, %arg6: memref<1x64xf32, #tpu.memory_space<vmem>>, %arg7: memref<2x256xf32, #tpu.memory_space<vmem>>) attributes {dimension_semantics = [#tpu.dimension_semantics<parallel>], iteration_bounds = array<i64: 1>, scalar_prefetch = 0 : i64, scratch_operands = 0 : i64, tpu.core_type = #tpu.core_type<tc>, window_params = [{transform_indices = @transform_0, window_bounds = array<i64: 2, 8, 32>}, {transform_indices = @transform_1, window_bounds = array<i64: 2, 8, 16>}, {pipeline_mode = #tpu.pipeline_mode<synchronous>, transform_indices = @transform_2, window_bounds = array<i64: 32, 32>}, {pipeline_mode = #tpu.pipeline_mode<synchronous>, transform_indices = @transform_3, window_bounds = array<i64: 1, 32>}, {pipeline_mode = #tpu.pipeline_mode<synchronous>, transform_indices = @transform_4, window_bounds = array<i64: 16, 64>}, {pipeline_mode = #tpu.pipeline_mode<synchronous>, transform_indices = @transform_5, window_bounds = array<i64: 1, 64>}, {transform_indices = @transform_6, window_bounds = array<i64: 2, 256>}]} {
    %c0 = arith.constant 0 : index
    %c0_0 = arith.constant 0 : index
    %0 = vector.load %arg3[%c0, %c0_0] : memref<32x32xf32, #tpu.memory_space<vmem>>, vector<32x32xf32>
    %c0_1 = arith.constant 0 : index
    %c0_2 = arith.constant 0 : index
    %1 = vector.load %arg4[%c0_1, %c0_2] : memref<1x32xf32, #tpu.memory_space<vmem>>, vector<1x32xf32>
    %c0_3 = arith.constant 0 : index
    %c0_4 = arith.constant 0 : index
    %2 = vector.load %arg5[%c0_3, %c0_4] : memref<16x64xf32, #tpu.memory_space<vmem>>, vector<16x64xf32>
    %c0_5 = arith.constant 0 : index
    %c0_6 = arith.constant 0 : index
    %3 = vector.load %arg6[%c0_5, %c0_6] : memref<1x64xf32, #tpu.memory_space<vmem>>, vector<1x64xf32>
    %c0_7 = arith.constant 0 : index
    %c0_8 = arith.constant 0 : index
    %c0_9 = arith.constant 0 : index
    %4 = vector.load %arg1[%c0_7, %c0_8, %c0_9] : memref<2x8x32xf32, #tpu.memory_space<vmem>>, vector<2x8x32xf32>
    %5 = vector.shape_cast %4 : vector<2x8x32xf32> to vector<16x32xf32>
    %c0_10 = arith.constant 0 : index
    %c0_11 = arith.constant 0 : index
    %c0_12 = arith.constant 0 : index
    %6 = vector.load %arg2[%c0_10, %c0_11, %c0_12] : memref<2x8x16xf32, #tpu.memory_space<vmem>>, vector<2x8x16xf32>
    %7 = vector.shape_cast %6 : vector<2x8x16xf32> to vector<16x16xf32>
    %cst = arith.constant dense<0.000000e+00> : vector<16x32xf32>
    %8 = tpu.matmul %5, %0, %cst {dimension_numbers = #tpu.dot_dimension_numbers<[1], [0], [0], [1], [0, 0, 1, 1], [], []>} : vector<16x32xf32>, vector<32x32xf32>, vector<16x32xf32> -> vector<16x32xf32>
    %9 = vector.broadcast %1 : vector<1x32xf32> to vector<16x32xf32>
    %10 = arith.addf %8, %9 : vector<16x32xf32>
    %cst_13 = arith.constant dense<0.000000e+00> : vector<16x64xf32>
    %11 = tpu.matmul %7, %2, %cst_13 {dimension_numbers = #tpu.dot_dimension_numbers<[1], [0], [0], [1], [0, 0, 1, 1], [], []>} : vector<16x16xf32>, vector<16x64xf32>, vector<16x64xf32> -> vector<16x64xf32>
    %12 = vector.broadcast %3 : vector<1x64xf32> to vector<16x64xf32>
    %13 = arith.addf %11, %12 : vector<16x64xf32>
    %cst_14 = arith.constant 0.176776692 : f32
    %14 = vector.broadcast %cst_14 : f32 to vector<16x32xf32>
    %15 = arith.mulf %10, %14 : vector<16x32xf32>
    %16 = vector.shape_cast %15 : vector<16x32xf32> to vector<2x8x32xf32>
    %17 = vector.extract_strided_slice %13 {offsets = [0, 0], sizes = [16, 32], strides = [1, 1]} : vector<16x64xf32> to vector<16x32xf32>
    %18 = vector.shape_cast %17 : vector<16x32xf32> to vector<2x8x32xf32>
    %19 = vector.extract_strided_slice %13 {offsets = [0, 32], sizes = [16, 32], strides = [1, 1]} : vector<16x64xf32> to vector<16x32xf32>
    %20 = vector.shape_cast %19 : vector<16x32xf32> to vector<2x8x32xf32>
    %cst_15 = arith.constant dense<0.000000e+00> : vector<2x8x8xf32>
    %21 = tpu.matmul %16, %18, %cst_15 {dimension_numbers = #tpu.dot_dimension_numbers<[2], [2], [1], [1], [0, 0, 0, 1, 1, 1], [0], [0]>} : vector<2x8x32xf32>, vector<2x8x32xf32>, vector<2x8x8xf32> -> vector<2x8x8xf32>
    %cst_16 = arith.constant dense<0xFF800000> : vector<2x8xf32>
    %22 = vector.multi_reduction <maximumf>, %21, %cst_16 [2] : vector<2x8x8xf32> to vector<2x8xf32>
    %23 = vector.shape_cast %22 : vector<2x8xf32> to vector<2x8x1xf32>
    %24 = vector.broadcast %23 : vector<2x8x1xf32> to vector<2x8x8xf32>
    %25 = arith.subf %21, %24 : vector<2x8x8xf32>
    %26 = math.exp %25 : vector<2x8x8xf32>
    %cst_17 = arith.constant dense<0.000000e+00> : vector<2x8xf32>
    %27 = vector.multi_reduction <add>, %26, %cst_17 [2] : vector<2x8x8xf32> to vector<2x8xf32>
    %28 = vector.shape_cast %27 : vector<2x8xf32> to vector<2x8x1xf32>
    %29 = tpu.reciprocal %28 : vector<2x8x1xf32> -> vector<2x8x1xf32>
    %30 = vector.broadcast %29 : vector<2x8x1xf32> to vector<2x8x8xf32>
    %31 = arith.mulf %26, %30 : vector<2x8x8xf32>
    %cst_18 = arith.constant dense<0.000000e+00> : vector<2x8x32xf32>
    %32 = tpu.matmul %31, %20, %cst_18 {dimension_numbers = #tpu.dot_dimension_numbers<[2], [1], [1], [2], [0, 0, 0, 1, 1, 2], [0], [0]>} : vector<2x8x8xf32>, vector<2x8x32xf32>, vector<2x8x32xf32> -> vector<2x8x32xf32>
    %33 = vector.shape_cast %32 : vector<2x8x32xf32> to vector<2x256xf32>
    %c0_19 = arith.constant 0 : index
    %c0_20 = arith.constant 0 : index
    %34 = vector.load %arg7[%c0_19, %c0_20] : memref<2x256xf32, #tpu.memory_space<vmem>>, vector<2x256xf32>
    tpu.vector_store %arg7[%c0_19, %c0_20], %33 {strides = array<i32>} : memref<2x256xf32, #tpu.memory_space<vmem>>, vector<2x256xf32>,
    return
  }
  func.func @transform_0(%arg0: i32) -> (i32, i32, i32) {
    %c0_i32 = arith.constant 0 : i32
    %c0_i32_0 = arith.constant 0 : i32
    %c0_i32_1 = arith.constant 0 : i32
    return %arg0, %c0_i32, %c0_i32_0 : i32, i32, i32
  }
  func.func @transform_1(%arg0: i32) -> (i32, i32, i32) {
    %c0_i32 = arith.constant 0 : i32
    %c0_i32_0 = arith.constant 0 : i32
    %c0_i32_1 = arith.constant 0 : i32
    return %arg0, %c0_i32, %c0_i32_0 : i32, i32, i32
  }
  func.func @transform_2(%arg0: i32) -> (i32, i32) {
    %c0_i32 = arith.constant 0 : i32
    %c0_i32_0 = arith.constant 0 : i32
    %c0_i32_1 = arith.constant 0 : i32
    return %c0_i32, %c0_i32_0 : i32, i32
  }
  func.func @transform_3(%arg0: i32) -> (i32, i32) {
    %c0_i32 = arith.constant 0 : i32
    %c0_i32_0 = arith.constant 0 : i32
    %c0_i32_1 = arith.constant 0 : i32
    return %c0_i32, %c0_i32_0 : i32, i32
  }
  func.func @transform_4(%arg0: i32) -> (i32, i32) {
    %c0_i32 = arith.constant 0 : i32
    %c0_i32_0 = arith.constant 0 : i32
    %c0_i32_1 = arith.constant 0 : i32
    return %c0_i32, %c0_i32_0 : i32, i32
  }
  func.func @transform_5(%arg0: i32) -> (i32, i32) {
    %c0_i32 = arith.constant 0 : i32
    %c0_i32_0 = arith.constant 0 : i32
    %c0_i32_1 = arith.constant 0 : i32
    return %c0_i32, %c0_i32_0 : i32, i32
  }
  func.func @transform_6(%arg0: i32) -> (i32, i32) {
    %c0_i32 = arith.constant 0 : i32
    %c0_i32_0 = arith.constant 0 : i32
    return %arg0, %c0_i32 : i32, i32
  }
}

</mosaic_0001>

<bundles_post_ra>
// kernel: tpu_custom_call.1
= control target key start
LH: loop header
LB: loop body
LE: loop exit
PB: predicated region body
PF: predicated region fallthrough
CT: control target
= control target key end

     0   :  { %11 = vsyncpa [#allocation3], 0  ;;  %s1123_s0 = inlined_call_operand.hbm [shape: f32[2,8,32], index: 0, kind: input, shape index: {}]   ;;  %s1124_s1 = inlined_call_operand.hbm [shape: f32[2,8,16], index: 1, kind: input, shape index: {}]   ;;  %s1125_s2 = inlined_call_operand.hbm [shape: f32[32,32], index: 2, kind: input, shape index: {}]   ;;  %s1126_s3 = inlined_call_operand.vmem [shape: f32[1,32], index: 3, kind: input, shape index: {}]   ;;  %s1127_s4 = inlined_call_operand.hbm [shape: f32[16,64], index: 4, kind: input, shape index: {}]   ;;  %s1128_s5 = inlined_call_operand.vmem [shape: f32[1,64], index: 5, kind: input, shape index: {}]   ;;  %s1129_s6 = inlined_call_operand.hbm [shape: f32[2,256], index: 6, kind: output, shape index: {}]  }
   0x1   :  { %12 = vsyncpa [#allocation6], 0 }
   0x2   :  { %13 = vsyncpa [#allocation9], 0 }
   0x3   :  { %14 = vsyncpa [#allocation4], 0  ;;  %s944_s21 = smov [#allocation5]   ;;  %s945_s23 = smov [#allocation2]  }
   0x4   :  { %s32_s22 = sshll.u32 %s944_s21, 4  ;;  %s20_s24 = sshll.u32 %s945_s23, 4  ;;  %s33_s22 = int_to_ptr.vmem [resolvable:$true] %s32_s22  ;;  %s993_s24 = int_to_ptr.vmem [resolvable:$true] %s20_s24 }
   0x5   :  { %s826_s27 = scalar_lea.hbm %s1124_s1, 256 }
   0x6   :  { %p827_p0 = scmp.ne.s32.totalorder %s1124_s1, %s826_s27  ;;  %p830_p1 = scmp.lt.u32.totalorder %s826_s27, %s1124_s1 }
   0x8   :  { %p832_p2 = pnand %p830_p1, %p827_p0 }
   0xa   :  { %835 = shalt.err (!%p832_p2)
}
   0xb   :  { %s836_s8 = scalar_lea.vmem %s33_s22, 256  ;;  %p841_p4 = scmp.lt.s32.totalorder %s33_s22, %s33_s22 }
   0xc   :  { %p837_p3 = scmp.ne.s32.totalorder %s33_s22, %s836_s8  ;;  %p842_p5 = scmp.lt.s32.totalorder %s836_s8, %s836_s8 }
   0xe   :  { %p843_p6 = por %p842_p5, %p841_p4 }
  0x10   :  { %p844_p7 = pnand %p843_p6, %p837_p3 }
  0x12   :  { %847 = shalt.err (!%p844_p7)
}
  0x13   :  { %s946_s9 = smov 128   ;;  %s947_s10 = smov 8  }
  0x14   :  { %38 = dma.hbm_to_vmem [thread:$0]  %s1124_s1, 256, %s33_s22, [#allocation6], %s946_s9, %s946_s9, %s947_s10  }
  0x15   :  { %s848_s15 = scalar_lea.hbm %s1123_s0, 256 }
  0x16   :  { %p849_p8 = scmp.ne.s32.totalorder %s1123_s0, %s848_s15  ;;  %p852_p9 = scmp.lt.u32.totalorder %s848_s15, %s1123_s0 }
  0x18   :  { %p854_p10 = pnand %p852_p9, %p849_p8 }
  0x1a   :  { %857 = shalt.err (!%p854_p10)
}
  0x1b   :  { %s858_s20 = scalar_lea.vmem %s993_s24, 256  ;;  %p863_p12 = scmp.lt.s32.totalorder %s993_s24, %s993_s24 }
  0x1c   :  { %p859_p11 = scmp.ne.s32.totalorder %s993_s24, %s858_s20  ;;  %p864_p13 = scmp.lt.s32.totalorder %s858_s20, %s858_s20 }
  0x1e   :  { %p865_p0 = por %p864_p13, %p863_p12 }
  0x20   :  { %p866_p1 = pnand %p865_p0, %p859_p11 }
  0x22   :  { %869 = shalt.err (!%p866_p1)
}
  0x23   :  { %26 = dma.hbm_to_vmem [thread:$0]  %s1123_s0, 256, %s993_s24, [#allocation3], %s946_s9, %s946_s9, %s947_s10  }
  0x24   :  { %s948_s22 = smov [#allocation7]   ;;  %s949_s25 = smov [#allocation8]  }
  0x25   :  { %s44_s23 = sshll.u32 %s948_s22, 4  ;;  %s58_s26 = sshll.u32 %s949_s25, 4  ;;  %s45_s23 = int_to_ptr.vmem [resolvable:$true] %s44_s23  ;;  %s1030_s26 = int_to_ptr.vmem [resolvable:$true] %s58_s26 }
  0x26   :  { %s870_s29 = scalar_lea.hbm %s1125_s2, 512 }
  0x27   :  { %p871_p2 = scmp.ne.s32.totalorder %s1125_s2, %s870_s29  ;;  %p874_p3 = scmp.lt.u32.totalorder %s870_s29, %s1125_s2 }
  0x29   :  { %p876_p4 = pnand %p874_p3, %p871_p2 }
  0x2b   :  { %879 = shalt.err (!%p876_p4)
}
  0x2c   :  { %s880_s0 = scalar_lea.vmem %s45_s23, 512  ;;  %p885_p6 = scmp.lt.s32.totalorder %s45_s23, %s45_s23 }
  0x2d   :  { %p881_p5 = scmp.ne.s32.totalorder %s45_s23, %s880_s0  ;;  %p886_p7 = scmp.lt.s32.totalorder %s880_s0, %s880_s0 }
  0x2f   :  { %p887_p8 = por %p886_p7, %p885_p6 }
  0x31   :  { %p888_p9 = pnand %p887_p8, %p881_p5 }
  0x33   :  { %891 = shalt.err (!%p888_p9)
}
  0x34   :  { %50 = dma.hbm_to_vmem [thread:$0]  %s1125_s2, 512, %s45_s23, [#allocation6], %s946_s9, %s946_s9, %s947_s10  }
  0x35   :  { %s892_s15 = scalar_lea.hbm %s1127_s4, 256 }
  0x36   :  { %p893_p10 = scmp.ne.s32.totalorder %s1127_s4, %s892_s15  ;;  %p896_p11 = scmp.lt.u32.totalorder %s892_s15, %s1127_s4 }
  0x38   :  { %p898_p12 = pnand %p896_p11, %p893_p10 }
  0x3a   :  { %901 = shalt.err (!%p898_p12)
}
  0x3b   :  { %s902_s20 = scalar_lea.vmem %s1030_s26, 256  ;;  %p907_p0 = scmp.lt.s32.totalorder %s1030_s26, %s1030_s26 }
  0x3c   :  { %p903_p13 = scmp.ne.s32.totalorder %s1030_s26, %s902_s20  ;;  %p908_p1 = scmp.lt.s32.totalorder %s902_s20, %s902_s20 }
  0x3e   :  { %p909_p2 = por %p908_p1, %p907_p0 }
  0x40   :  { %p910_p3 = pnand %p909_p2, %p903_p13 }
  0x42   :  { %913 = shalt.err (!%p910_p3)
}
  0x43   :  { %64 = dma.hbm_to_vmem [thread:$0]  %s1127_s4, 256, %s1030_s26, [#allocation9], %s946_s9, %s946_s9, %s947_s10  }
  0x44   :  { %936 = dma.done.wait [#allocation3], 256  }
  0x45   :  { %937 = vsyncadd [#allocation3], 4294967040 }
  0x46   :  { %938 = dma.done.wait [#allocation6], 768  }
  0x47   :  { %939 = vsyncadd [#allocation6], 4294966528 }
  0x48   :  { %940 = dma.done.wait [#allocation9], 256  }
  0x49   :  { %941 = vsyncadd [#allocation9], 4294967040  ;;  %v79_v0 = vld [vmem:[#allocation7] sm:$0xff]  ;;  %v80_v1 = vld [vmem:[#allocation7 + $0x8] sm:$0xff]  ;;  %vm185_vm0 = vcmask 130048   ;;  %vm97_vm1 = vcmask 261120   ;;  %v600_v52 = vlaneseq }
  0x4a   :  { %v84_v2 = vld [vmem:[#allocation8] sm:$0xff]  ;;  %v792_v3 = vpack.c.bf16 %v80_v1, %v79_v0  ;;  %v85_v4 = vld [vmem:[#allocation8 + $0x8] sm:$0xff]  ;;  %v81_v5 = vld [vmem:[#allocation7 + $0x10] sm:$0xff]  ;;  %v950_v13 = vmov 0.0   ;;  %vm951_vm2 = vmmov 0   ;;  %vm421_vm3 = vcmask 64512  }
  0x4b   :  { %v82_v6 = vld [vmem:[#allocation7 + $0x18] sm:$0xff]  ;;  %v800_v7 = vpack.c.bf16 %v85_v4, %v84_v2  ;;  %v89_v9 = vld [vmem:[#allocation5] sm:$0xff]  ;;  %v87_v10 = vld [vmem:[#allocation2] sm:$0xff]  ;;  %v953_v50 = vmov 1983009808   ;;  %v601_v54 = vshrl.u32 %v600_v52, 7 }
  0x4c   :  { %v796_v8 = vpack.c.bf16 %v82_v6, %v81_v5  ;;  %793 = vmatprep.subr.bf16.mxu0 %v792_v3  ;;  %769 = vmatprep.mubr.msk.f32.mxu1 %vm185_vm0, %v89_v9  ;;  %v90_v11 = vld [vmem:[#allocation5 + $0x8] sm:$0xff]  ;;  %v88_v12 = vld [vmem:[#allocation2 + $0x8] sm:$0xff]  ;;  %v726_v14 = vld [vmem:[%s1128_s5] ss:$0 sm:$0xff]  ;;  %v598_v51 = vunpack.c.l.s4 %v953_v50  ;;  %v954_v55 = vmov 1934713408  }
  0x4d   :  { %795 = vmatpush3.bf16.msra.mxu0 %v792_v3  ;;  %801 = vmatprep.subr.bf16.mxu1 %v800_v7  ;;  %v723_v18 = vld [vmem:[%s1126_s3] ss:$0 sm:$0xff]  ;;  %s952_s3 = smov 96   ;;  %v629_v56 = vunpack.c.l.s4 %v954_v55  ;;  %s955_s5 = smov 64   ;;  %vm687_vm4 = vcmask 523264   ;;  %vm689_vm5 = vcmask 785408  }
  0x4e   :  { %803 = vmatpush3.bf16.msra.mxu1 %v800_v7  ;;  %797 = vmatprep.subr.bf16.mxu0 %v796_v8  ;;  %v599_v53 = vunpack.c.0.s8 %v598_v51  ;;  %s956_s22 = smov 32   ;;  %s957_s23 = smov [#allocation10]  }
  0x4f   :  { %762 = vmatprep.mubr.msk.f32.mxu0 %vm97_vm1, %v87_v10  ;;  %772 = vmatprep.subr.mxu1 %v950_v13  ;;  %v630_v60 = vunpack.c.0.s8 %v629_v56  ;;  %s712_s25 = sshll.u32 %s957_s23, 4  ;;  %s713_s25 = int_to_ptr.vmem [resolvable:$true] %s712_s25 }
  0x50   :  { %v602_v58 = vsub.s32 %v599_v53, %v601_v54  ;;  %s914_s26 = scalar_lea.vmem %s713_s25, 64  ;;  %p919_p5 = scmp.lt.s32.totalorder %s713_s25, %s713_s25 }
  0x51   :  { %799 = vmatpush3.bf16.msra.mxu0 %v796_v8  ;;  %770 = vmatmul.mubr.msk.f32.vlgmr.msra.gmra.mrb[0].mxu1 %vm185_vm0, %v90_v11  ;;  %v633_v2 = vsub.s32 %v630_v60, %v601_v54  ;;  %p915_p4 = scmp.ne.s32.totalorder %s713_s25, %s914_s26  ;;  %p920_p6 = scmp.lt.s32.totalorder %s914_s26, %s914_s26 }
  0x52   :  { %777 = vmatprep.subr.mxu0 %v950_v13  ;;  %774 = vmatprep.mubr.msk.f32.mxu1 %vm951_vm2, %v950_v13 }
  0x53   :  { %p921_p7 = por %p920_p6, %p919_p5 }
  0x54   :  { %763 = vmatmul.mubr.msk.f32.vlgmr.msra.gmra.mrb[0].mxu0 %vm97_vm1, %v88_v12 }
  0x55   :  { %779 = vmatprep.mubr.msk.f32.mxu0 %vm951_vm2, %v950_v13  ;;  %p922_p8 = pnand %p921_p7, %p915_p4 }
 0x124   :  { %v771_v15 = vpop.f32.mrb[0].mxu1 }
 0x125   :  { %v264_v16 = vadd.f32 %v771_v15, %v726_v14  ;;  %v258_v17 = vpop.f32.mrb[1].mxu1 }
 0x126   :  { %v259_v19 = vadd.f32 %v726_v14, %v258_v17 }
 0x127   :  { %v764_v20 = vpop.f32.mrb[0].mxu0  ;;  %778 = vmatpush3.xpose.msk.msra.mxu0 %vm97_vm1, %v264_v16 }
 0x128   :  { %v176_v21 = vadd.f32 %v764_v20, %v723_v18  ;;  %v170_v22 = vpop.f32.mrb[1].mxu0  ;;  %773 = vmatpush3.xpose.msk.msra.mxu1 %vm97_vm1, %v259_v19  ;;  %787 = vmatprep.subr.mxu0 %v950_v13 }
 0x129   :  { %v171_v23 = vadd.f32 %v723_v18, %v170_v22  ;;  %782 = vmatprep.subr.mxu1 %v950_v13 }
 0x12a   :  { %v268_v24 = vmul.f32 0.17677669, %v176_v21 }
 0x12b   :  { %v267_v25 = vmul.f32 0.17677669, %v171_v23 }
 0x12c   :  { %780 = vmatmul.mubr.msk.f32.vlgmr.msra.gmra.mrb[2].mxu0 %vm97_vm1, %v268_v24 }
 0x12d   :  { %775 = vmatmul.mubr.msk.f32.vlgmr.msra.gmra.mrb[2].mxu1 %vm97_vm1, %v267_v25  ;;  %789 = vmatprep.mubr.msk.f32.mxu0 %vm951_vm2, %v950_v13 }
 0x12e   :  { %784 = vmatprep.mubr.msk.f32.mxu1 %vm951_vm2, %v950_v13 }
 0x1ff   :  { %v417_v26 = vpop.f32.mrb[2].mxu0 }
 0x200   :  { %v341_v27 = vpop.f32.mrb[2].mxu1  ;;  %v781_v28 = vpop.f32.mrb[3].mxu0  ;;  %v425_v31 = vsel %vm421_vm3, %v417_v26, -inf }
 0x201   :  { %v776_v29 = vpop.f32.mrb[3].mxu1  ;;  %v422_v30 = vsel %vm421_vm3, %v341_v27, -inf }
 0x202   :  { %423 = vmax.xlane.f32.xlu0 %v422_v30 }
 0x206   :  { %426 = vmax.xlane.f32.xlu0 %v425_v31 }
 0x21c   :  { %444 = vrot.lane.b32.xlu0 %v259_v19, %s952_s3 }
 0x28f   :  { %v424_v32 = vpop.xlane.xlu0 %423 }
 0x290   :  { %v428_v33 = vsub.f32 %v341_v27, %v424_v32 }
 0x292   :  { %v430_v36 = vmul.f32 1.442695, %v428_v33 }
 0x293   :  { %v427_v34 = vpop.xlane.xlu0 %426 }
 0x294   :  { %v429_v35 = vsub.f32 %v417_v26, %v427_v34 }
 0x296   :  { %v432_v37 = vmul.f32 1.442695, %v429_v35 }
 0x297   :  { %v445_v38 = vpop.permute.xlu0 %444 }
 0x298   :  { %818 = vpow2.f32 %v432_v37  ;;  %783 = vmatpush3.msra.mxu1 %v445_v38 }
 0x299   :  { %820 = vpow2.f32 %v430_v36 }
 0x2a2   :  { %v819_v39 = vpop.eup %818 }
 0x2a3   :  { %v437_v40 = vsel %vm421_vm3, %v819_v39, 0.0  ;;  %v821_v41 = vpop.eup %820 }
 0x2a4   :  { %438 = vadd.xlane.f32.xlu1 %v437_v40  ;;  %v434_v42 = vsel %vm421_vm3, %v821_v41, 0.0 }
 0x2a8   :  { %435 = vadd.xlane.f32.xlu1 %v434_v42 }
 0x2b9   :  { %520 = vrot.lane.b32.xlu1 %v264_v16, %s952_s3 }
 0x331   :  { %v439_v43 = vpop.xlane.xlu1 %438 }
 0x332   :  { %822 = vrcp.f32 %v439_v43 }
 0x335   :  { %v436_v44 = vpop.xlane.xlu1 %435 }
 0x336   :  { %824 = vrcp.f32 %v436_v44 }
 0x339   :  { %v521_v45 = vpop.permute.xlu1 %520 }
 0x33a   :  { %788 = vmatpush3.msra.mxu0 %v521_v45 }
 0x33c   :  { %v823_v46 = vpop.eup %822 }
 0x33d   :  { %v443_v47 = vmul.f32 %v823_v46, %v819_v39 }
 0x33f   :  { %790 = vmatmul.mubr.msk.f32.vlgmr.msra.gmra.mrb[4].mxu0 %vm421_vm3, %v443_v47 }
 0x340   :  { %v825_v48 = vpop.eup %824 }
 0x341   :  { %v442_v49 = vmul.f32 %v825_v48, %v821_v41 }
 0x343   :  { %785 = vmatmul.mubr.msk.f32.vlgmr.msra.gmra.mrb[4].mxu1 %vm421_vm3, %v442_v49 }
 0x412   :  { %v592_v57 = vpop.f32.mrb[4].mxu0 }
 0x413   :  { %v791_v59 = vpop.f32.mrb[5].mxu0  ;;  %v611_v61 = vcombine.high %v592_v57, %v950_v13  ;;  %v618_v63 = vrot.slane %v592_v57, %v602_v58 }
 0x415   :  { %v625_v4 = vrot.slane %v611_v61, %v602_v58 }
 0x416   :  { %v516_v62 = vpop.f32.mrb[4].mxu1 }
 0x417   :  { %v596_v0 = vcombine.high %v516_v62, %v950_v13  ;;  %v603_v1 = vrot.slane %v516_v62, %v602_v58  ;;  %v786_v3 = vpop.f32.mrb[5].mxu1 }
 0x419   :  { %v610_v5 = vrot.slane %v596_v0, %v602_v58  ;;  %v626_v6 = vcombine.low %v603_v1, %v618_v63  ;;  %v627_v7 = vcombine.high %v603_v1, %v618_v63 }
 0x41b   :  { %v634_v8 = vrot.slane %v626_v6, %v633_v2  ;;  %v642_v9 = vcombine.low %v610_v5, %v625_v4  ;;  %v643_v10 = vcombine.high %v610_v5, %v625_v4  ;;  %v641_v11 = vrot.slane %v627_v7, %v633_v2 }
 0x41d   :  { %667 = vrot.lane.b32.xlu0 %v641_v11, %s955_s5  ;;  %v658_v12 = vcombine.high %v634_v8, %v950_v13  ;;  %v659_v14 = vcombine.high %v641_v11, %v950_v13  ;;  %v657_v15 = vrot.slane %v643_v10, %v633_v2  ;;  %v650_v16 = vrot.slane %v642_v9, %v633_v2 }
 0x41f   :  { %663 = vrot.lane.b32.xlu1 %v658_v12, %s956_s22  ;;  %v660_v17 = vcombine.high %v650_v16, %v950_v13  ;;  %v661_v18 = vcombine.high %v657_v15, %v950_v13 }
 0x421   :  { %671 = vrot.lane.b32.xlu0 %v659_v14, %s952_s3 }
 0x423   :  { %679 = vrot.lane.b32.xlu1 %v657_v15, %s955_s5 }
 0x427   :  { %675 = vrot.lane.b32.xlu1 %v660_v17, %s956_s22 }
 0x42b   :  { %683 = vrot.lane.b32.xlu1 %v661_v18, %s952_s3 }
 0x48f   :  { %v668_v20 = vpop.permute.xlu0 %667 }
 0x491   :  { %v664_v19 = vpop.permute.xlu1 %663 }
 0x492   :  { %v686_v22 = vsel %vm97_vm1, %v634_v8, %v664_v19 }
 0x493   :  { %v672_v25 = vpop.permute.xlu0 %671  ;;  %v688_v26 = vsel %vm687_vm4, %v686_v22, %v668_v20 }
 0x494   :  { %v690_v29 = vsel %vm689_vm5, %v688_v26, %v672_v25 }
 0x495   :  { %v680_v21 = vpop.permute.xlu1 %679 }
 0x499   :  { %v676_v23 = vpop.permute.xlu1 %675 }
 0x49a   :  { %v691_v24 = vsel %vm97_vm1, %v650_v16, %v676_v23 }
 0x49b   :  { %v692_v27 = vsel %vm687_vm4, %v691_v24, %v680_v21 }
 0x49d   :  { %v684_v28 = vpop.permute.xlu1 %683 }
 0x49e   :  { %v693_v13 = vsel %vm689_vm5, %v692_v27, %v684_v28 }
 0x49f   :  { %v696_v30 = vcombine.low %v690_v29, %v693_v13 }
 0x4a1   :  { %735 = vst.sshfl [vmem:[#allocation10] sm:$0x33 pattern:$0x76325410] %v696_v30 }
 0x4a2   :  { %925 = shalt.err (!%p922_p8)
}
 0x4a3   :  { %s926_s29 = scalar_lea.hbm %s1129_s6, 64 }
 0x4a4   :  { %p927_p9 = scmp.ne.s32.totalorder %s1129_s6, %s926_s29  ;;  %p930_p10 = scmp.lt.u32.totalorder %s926_s29, %s1129_s6 }
 0x4a6   :  { %p932_p11 = pnand %p930_p10, %p927_p9 }
 0x4a8   :  { %935 = shalt.err (!%p932_p11)
}
 0x4a9   :  { %715 = dma.vmem_to_hbm [thread:$0]  %s713_s25, 64, %s1129_s6, [#allocation4]  }
 0x4aa   :  { %942 = dma.done.wait [#allocation4], 64  }
 0x4ab   :  { %943 = vsyncadd [#allocation4], 4294967232 }
 0x4ac   :  { %719 = vsyncpa [#allocation3], 1 }
 0x4ad   :  { %720 = vsyncpa [#allocation6], 1 }
 0x4ae   :  { %721 = vsyncpa [#allocation9], 1 }
 0x4af   :  { %722 = vsyncpa [#allocation4], 1 }

</bundles_post_ra>
